<compile_context>
chip_gen: v6e
topology: v6e:2x2x1
jax: 0.10.0
libtpu: 0.0.40
codegen_flags: <defaults>
</compile_context>

<pallas_src>
import jax
import jax.numpy as jnp
from jax.experimental import pallas as pl
from jax.experimental.pallas import tpu as pltpu


_LANES = 128
_SUBLANES = 8


def _cdiv(a, b):
    return -(-a // b)


def _round_up(x, m):
    return ((x + m - 1) // m) * m


def _make_dice_kernel(nc, hw, tm, tk):
    """Builds the per-tile partial-sum kernel for a (nc, hw) problem."""
    n_i = _cdiv(nc, tm)
    n_k = _cdiv(hw, tk)
    n_lane_blocks = tk // _LANES
    col_ragged = (hw % tk) != 0
    row_ragged = (nc % tm) != 0

    def kernel(x_ref, t_ref, num_ref, den_ref, acc_num, acc_den):
        i = pl.program_id(0)
        k = pl.program_id(1)

        @pl.when(k == 0)
        def _():
            acc_num[...] = jnp.zeros_like(acc_num)
            acc_den[...] = jnp.zeros_like(acc_den)

        def accumulate(masked):
            # Cast on load; all math in f32 (v5e VPU/EUP have no bf16).
            x = x_ref[...].astype(jnp.float32)
            t = t_ref[...].astype(jnp.float32)
            # sigmoid via a single EUP transcendental.
            s = 0.5 * (jnp.tanh(0.5 * x) + 1.0)
            prod = s * t
            ssum = s + t
            if masked:
                mask = None
                if col_ragged:
                    col = k * tk + jax.lax.broadcasted_iota(
                        jnp.int32, (tm, tk), 1)
                    mask = col < hw
                if row_ragged:
                    row = i * tm + jax.lax.broadcasted_iota(
                        jnp.int32, (tm, tk), 0)
                    rmask = row < nc
                    mask = rmask if mask is None else jnp.logical_and(mask, rmask)
                # where (not multiply) so stale NaNs in the OOB region vanish.
                prod = jnp.where(mask, prod, 0.0)
                ssum = jnp.where(mask, ssum, 0.0)
            # Lane-partial accumulation: static lane-aligned 128-wide slices
            # summed with pure VPU adds (no in-kernel cross-lane reduce).
            pnum = prod[:, 0:_LANES]
            pden = ssum[:, 0:_LANES]
            for j in range(1, n_lane_blocks):
                sl = slice(j * _LANES, (j + 1) * _LANES)
                pnum = pnum + prod[:, sl]
                pden = pden + ssum[:, sl]
            acc_num[...] += pnum
            acc_den[...] += pden

        if col_ragged or row_ragged:
            conds = []
            if col_ragged:
                conds.append(k == n_k - 1)
            if row_ragged:
                conds.append(i == n_i - 1)
            edge = conds[0] if len(conds) == 1 else jnp.logical_or(*conds)

            @pl.when(jnp.logical_not(edge))
            def _():
                accumulate(masked=False)

            @pl.when(edge)
            def _():
                accumulate(masked=True)
        else:
            accumulate(masked=False)

        @pl.when(k == n_k - 1)
        def _():
            # Lane-dense (tm, 128) writeback; accumulator is already lane-wide.
            num_ref[...] = acc_num[...]
            den_ref[...] = acc_den[...]

    return kernel


def dice_loss(inputs, target, smooth=1e-6, *, tm=None, tk=None):
    """Dice loss matching the PyTorch DiceLoss.forward semantics.

    inputs, target: (N, C, H, W) arrays (any float dtype). Returns f32 scalar.
    """
    assert inputs.shape == target.shape, "Input sizes must be equal."
    assert inputs.ndim == 4, "Input must be a 4D Tensor."

    n, c, h, w = inputs.shape
    nc, hw = n * c, h * w

    # Free metadata reshape (row-major contiguous); no HBM copy, no padding.
    x2 = inputs.reshape(nc, hw)
    t2 = target.reshape(nc, hw)

    nc_pad8 = _round_up(nc, _SUBLANES)
    hw_pad128 = _round_up(hw, _LANES)

    if tm is None:
        # Aim for >=2 blocks along the "parallel" NC axis (v7x: 2 TCs),
        # capped at 256 rows per tile.
        tm = min(256, _round_up(_cdiv(nc, 2), _SUBLANES))
    tm = max(_SUBLANES, _round_up(min(int(tm), nc_pad8), _SUBLANES))

    if tk is None:
        tk = 4096  # 4 MiB f32 per input tile; ~16 MiB with double buffering.
    tk = max(_LANES, _round_up(min(int(tk), hw_pad128), _LANES))

    grid = (_cdiv(nc, tm), _cdiv(hw, tk))
    # NOTE: for tiny N*C with huge H*W only one "parallel" block exists; a
    # two-level reduction (outer parallel HW split -> partial slabs combined
    # in the epilogue) would engage both v7x TensorCores in that regime.

    total = nc * hw
    in_bytes = (total * jnp.dtype(x2.dtype).itemsize
                + total * jnp.dtype(t2.dtype).itemsize)
    out_bytes = 2 * nc * _LANES * 4
    cost = pl.CostEstimate(
        flops=6 * total,           # mul/add for num & den + lane-partial adds
        transcendentals=total,     # one tanh per element
        bytes_accessed=in_bytes + out_bytes,
    )

    # Raise the scoped VMEM limit so the unified tile defaults fit on every
    # generation (v5e scoped default is only 16 MiB); stay within v7x's
    # 64 MiB physical VMEM.
    buf_bytes = (2 * 2 * tm * tk * 4            # 2 inputs x 2 pipeline buffers
                 + 2 * 2 * tm * _LANES * 4      # 2 outputs x 2 buffers
                 + 2 * tm * _LANES * 4)         # 2 scratch accumulators
    vmem_limit = int(min(48 << 20, max(32 << 20, buf_bytes + buf_bytes // 2)))

    num_out, den_out = pl.pallas_call(
        _make_dice_kernel(nc, hw, tm, tk),
        out_shape=(
            jax.ShapeDtypeStruct((nc, _LANES), jnp.float32),
            jax.ShapeDtypeStruct((nc, _LANES), jnp.float32),
        ),
        grid=grid,
        in_specs=[
            pl.BlockSpec((tm, tk), lambda i, k: (i, k)),
            pl.BlockSpec((tm, tk), lambda i, k: (i, k)),
        ],
        out_specs=(
            pl.BlockSpec((tm, _LANES), lambda i, k: (i, 0)),
            pl.BlockSpec((tm, _LANES), lambda i, k: (i, 0)),
        ),
        scratch_shapes=[
            pltpu.VMEM((tm, _LANES), jnp.float32),
            pltpu.VMEM((tm, _LANES), jnp.float32),
        ],
        compiler_params=pltpu.CompilerParams(
            dimension_semantics=("parallel", "arbitrary"),
            vmem_limit_bytes=vmem_limit,
        ),
        cost_estimate=cost,
    )(x2, t2)

    # Tiny JAX epilogue: 128-wide lane reduce, nonlinear divide, mean.
    numerator = 2.0 * jnp.sum(num_out, axis=1)
    denominator = jnp.sum(den_out, axis=1)
    dice_score = (numerator + smooth) / (denominator + smooth)
    return jnp.mean(1.0 - dice_score)


def dice_loss_ref(inputs, target, smooth=1e-6):
    """Pure-JAX reference (mirrors the PyTorch code exactly)."""
    x = jax.nn.sigmoid(inputs).astype(jnp.float32)
    t = target.astype(jnp.float32)
    numerator = 2.0 * jnp.sum(x * t, axis=(2, 3))
    denominator = jnp.sum(x + t, axis=(2, 3))
    dice_score = (numerator + smooth) / (denominator + smooth)
    return jnp.mean(1.0 - dice_score)


if __name__ == "__main__":
    key = jax.random.PRNGKey(0)
    k1, k2, k3, k4 = jax.random.split(key, 4)

    # Primary small test: (N, C, H, W) = (2, 4, 16, 16), fully aligned path.
    N, C, H, W = 2, 4, 16, 16
    x = jax.random.normal(k1, (N, C, H, W), dtype=jnp.float32)
    tgt = jax.random.uniform(k2, (N, C, H, W), dtype=jnp.float32)

    loss = jax.block_until_ready(dice_loss(x, tgt))
    ref = jax.block_until_ready(dice_loss_ref(x, tgt))
    assert jnp.allclose(loss, ref, atol=1e-5, rtol=1e-5), (loss, ref)

    # Ragged NC and HW + forced small HW tile: exercises the in-kernel
    # row/column masking and the multi-step accumulator path on-device.
    N2, C2, H2, W2 = 2, 3, 13, 17
    x_b = jax.random.normal(k3, (N2, C2, H2, W2), dtype=jnp.float32)
    t_b = jax.random.uniform(k4, (N2, C2, H2, W2), dtype=jnp.float32)

    loss_b = jax.block_until_ready(dice_loss(x_b, t_b, tk=128))
    ref_b = jax.block_until_ready(dice_loss_ref(x_b, t_b))
    assert jnp.allclose(loss_b, ref_b, atol=1e-5, rtol=1e-5), (loss_b, ref_b)

    print("KERNEL_OK")
</pallas_src>

<mosaic_0001>
module attributes {stable_mosaic.version = 11 : i64} {
  func.func @kernel(%arg0: i32, %arg1: i32, %arg2: memref<8x256xf32, #tpu.memory_space<vmem>>, %arg3: memref<8x256xf32, #tpu.memory_space<vmem>>, %arg4: memref<8x128xf32, #tpu.memory_space<vmem>>, %arg5: memref<8x128xf32, #tpu.memory_space<vmem>>, %arg6: memref<8x128xf32, #tpu.memory_space<vmem>>, %arg7: memref<8x128xf32, #tpu.memory_space<vmem>>) attributes {dimension_semantics = [#tpu.dimension_semantics<parallel>, #tpu.dimension_semantics<arbitrary>], iteration_bounds = array<i64: 1, 1>, scalar_prefetch = 0 : i64, scratch_operands = 2 : i64, tpu.core_type = #tpu.core_type<tc>, window_params = [{transform_indices = @transform_0, window_bounds = array<i64: 8, 256>}, {transform_indices = @transform_1, window_bounds = array<i64: 8, 256>}, {transform_indices = @transform_2, window_bounds = array<i64: 8, 128>}, {transform_indices = @transform_3, window_bounds = array<i64: 8, 128>}]} {
    %c0_i32 = arith.constant 0 : i32
    %0 = arith.cmpi eq, %arg1, %c0_i32 : i32
    %1 = arith.extui %0 : i1 to i32
    %c0_i32_0 = arith.constant 0 : i32
    %2 = arith.cmpi ne, %1, %c0_i32_0 : i32
    scf.if %2 {
      %cst_16 = arith.constant 0.000000e+00 : f32
      %29 = vector.broadcast %cst_16 : f32 to vector<8x128xf32>
      %c0_17 = arith.constant 0 : index
      %c0_18 = arith.constant 0 : index
      %30 = vector.load %arg6[%c0_17, %c0_18] : memref<8x128xf32, #tpu.memory_space<vmem>>, vector<8x128xf32>
      tpu.vector_store %arg6[%c0_17, %c0_18], %29 {strides = array<i32>} : memref<8x128xf32, #tpu.memory_space<vmem>>, vector<8x128xf32>,
      %cst_19 = arith.constant 0.000000e+00 : f32
      %31 = vector.broadcast %cst_19 : f32 to vector<8x128xf32>
      %c0_20 = arith.constant 0 : index
      %c0_21 = arith.constant 0 : index
      %32 = vector.load %arg7[%c0_20, %c0_21] : memref<8x128xf32, #tpu.memory_space<vmem>>, vector<8x128xf32>
      tpu.vector_store %arg7[%c0_20, %c0_21], %31 {strides = array<i32>} : memref<8x128xf32, #tpu.memory_space<vmem>>, vector<8x128xf32>,
    } else {
    }
    %c0 = arith.constant 0 : index
    %c0_1 = arith.constant 0 : index
    %3 = vector.load %arg2[%c0, %c0_1] : memref<8x256xf32, #tpu.memory_space<vmem>>, vector<8x256xf32>
    %c0_2 = arith.constant 0 : index
    %c0_3 = arith.constant 0 : index
    %4 = vector.load %arg3[%c0_2, %c0_3] : memref<8x256xf32, #tpu.memory_space<vmem>>, vector<8x256xf32>
    %cst = arith.constant 5.000000e-01 : f32
    %5 = vector.broadcast %cst : f32 to vector<8x256xf32>
    %6 = arith.mulf %5, %3 : vector<8x256xf32>
    %7 = math.tanh %6 : vector<8x256xf32>
    %cst_4 = arith.constant 1.000000e+00 : f32
    %8 = vector.broadcast %cst_4 : f32 to vector<8x256xf32>
    %9 = arith.addf %7, %8 : vector<8x256xf32>
    %cst_5 = arith.constant 5.000000e-01 : f32
    %10 = vector.broadcast %cst_5 : f32 to vector<8x256xf32>
    %11 = arith.mulf %10, %9 : vector<8x256xf32>
    %12 = arith.mulf %11, %4 : vector<8x256xf32>
    %13 = arith.addf %11, %4 : vector<8x256xf32>
    %14 = vector.extract_strided_slice %12 {offsets = [0, 0], sizes = [8, 128], strides = [1, 1]} : vector<8x256xf32> to vector<8x128xf32>
    %15 = vector.extract_strided_slice %13 {offsets = [0, 0], sizes = [8, 128], strides = [1, 1]} : vector<8x256xf32> to vector<8x128xf32>
    %16 = vector.extract_strided_slice %12 {offsets = [0, 128], sizes = [8, 128], strides = [1, 1]} : vector<8x256xf32> to vector<8x128xf32>
    %17 = arith.addf %14, %16 : vector<8x128xf32>
    %18 = vector.extract_strided_slice %13 {offsets = [0, 128], sizes = [8, 128], strides = [1, 1]} : vector<8x256xf32> to vector<8x128xf32>
    %19 = arith.addf %15, %18 : vector<8x128xf32>
    %c0_6 = arith.constant 0 : index
    %c0_7 = arith.constant 0 : index
    %20 = vector.load %arg6[%c0_6, %c0_7] : memref<8x128xf32, #tpu.memory_space<vmem>>, vector<8x128xf32>
    %21 = arith.addf %20, %17 : vector<8x128xf32>
    %c0_8 = arith.constant 0 : index
    %c0_9 = arith.constant 0 : index
    %22 = vector.load %arg6[%c0_8, %c0_9] : memref<8x128xf32, #tpu.memory_space<vmem>>, vector<8x128xf32>
    tpu.vector_store %arg6[%c0_8, %c0_9], %21 {strides = array<i32>} : memref<8x128xf32, #tpu.memory_space<vmem>>, vector<8x128xf32>,
    %c0_10 = arith.constant 0 : index
    %c0_11 = arith.constant 0 : index
    %23 = vector.load %arg7[%c0_10, %c0_11] : memref<8x128xf32, #tpu.memory_space<vmem>>, vector<8x128xf32>
    %24 = arith.addf %23, %19 : vector<8x128xf32>
    %c0_12 = arith.constant 0 : index
    %c0_13 = arith.constant 0 : index
    %25 = vector.load %arg7[%c0_12, %c0_13] : memref<8x128xf32, #tpu.memory_space<vmem>>, vector<8x128xf32>
    tpu.vector_store %arg7[%c0_12, %c0_13], %24 {strides = array<i32>} : memref<8x128xf32, #tpu.memory_space<vmem>>, vector<8x128xf32>,
    %c0_i32_14 = arith.constant 0 : i32
    %26 = arith.cmpi eq, %arg1, %c0_i32_14 : i32
    %27 = arith.extui %26 : i1 to i32
    %c0_i32_15 = arith.constant 0 : i32
    %28 = arith.cmpi ne, %27, %c0_i32_15 : i32
    scf.if %28 {
      %c0_16 = arith.constant 0 : index
      %c0_17 = arith.constant 0 : index
      %29 = vector.load %arg6[%c0_16, %c0_17] : memref<8x128xf32, #tpu.memory_space<vmem>>, vector<8x128xf32>
      %c0_18 = arith.constant 0 : index
      %c0_19 = arith.constant 0 : index
      %30 = vector.load %arg4[%c0_18, %c0_19] : memref<8x128xf32, #tpu.memory_space<vmem>>, vector<8x128xf32>
      tpu.vector_store %arg4[%c0_18, %c0_19], %29 {strides = array<i32>} : memref<8x128xf32, #tpu.memory_space<vmem>>, vector<8x128xf32>,
      %c0_20 = arith.constant 0 : index
      %c0_21 = arith.constant 0 : index
      %31 = vector.load %arg7[%c0_20, %c0_21] : memref<8x128xf32, #tpu.memory_space<vmem>>, vector<8x128xf32>
      %c0_22 = arith.constant 0 : index
      %c0_23 = arith.constant 0 : index
      %32 = vector.load %arg5[%c0_22, %c0_23] : memref<8x128xf32, #tpu.memory_space<vmem>>, vector<8x128xf32>
      tpu.vector_store %arg5[%c0_22, %c0_23], %31 {strides = array<i32>} : memref<8x128xf32, #tpu.memory_space<vmem>>, vector<8x128xf32>,
    } else {
    }
    return
  }
  func.func @transform_0(%arg0: i32, %arg1: i32) -> (i32, i32) {
    %c0_i32 = arith.constant 0 : i32
    return %arg0, %arg1 : i32, i32
  }
  func.func @transform_1(%arg0: i32, %arg1: i32) -> (i32, i32) {
    %c0_i32 = arith.constant 0 : i32
    return %arg0, %arg1 : i32, i32
  }
  func.func @transform_2(%arg0: i32, %arg1: i32) -> (i32, i32) {
    %c0_i32 = arith.constant 0 : i32
    %c0_i32_0 = arith.constant 0 : i32
    return %arg0, %c0_i32 : i32, i32
  }
  func.func @transform_3(%arg0: i32, %arg1: i32) -> (i32, i32) {
    %c0_i32 = arith.constant 0 : i32
    %c0_i32_0 = arith.constant 0 : i32
    return %arg0, %c0_i32 : i32, i32
  }
}

</mosaic_0001>

<bundles_post_ra>
// kernel: tpu_custom_call.1
= control target key start
LH: loop header
LB: loop body
LE: loop exit
PB: predicated region body
PF: predicated region fallthrough
CT: control target
= control target key end

     0   :  { %9 = vsyncpa [#allocation5], 0  ;;  %s238_s0 = inlined_call_operand.hbm [shape: f32[8,256], index: 0, kind: input, shape index: {}]   ;;  %s239_s1 = inlined_call_operand.hbm [shape: f32[8,256], index: 1, kind: input, shape index: {}]   ;;  %s240_s2 = inlined_call_operand.hbm [shape: f32[8,128], index: 2, kind: output, shape index: {0}]   ;;  %s241_s3 = inlined_call_operand.hbm [shape: f32[8,128], index: 3, kind: output, shape index: {1}]  }
   0x1   :  { %10 = vsyncpa [#allocation8], 0 }
   0x2   :  { %11 = vsyncpa [#allocation6], 0 }
   0x3   :  { %12 = vsyncpa [#allocation11], 0  ;;  %s202_s12 = smov [#allocation4]   ;;  %s203_s14 = smov [#allocation7]  }
   0x4   :  { %s19_s13 = sshll.u32 %s202_s12, 4  ;;  %s29_s15 = sshll.u32 %s203_s14, 4  ;;  %s20_s13 = int_to_ptr.vmem [resolvable:$true] %s19_s13  ;;  %s30_s15 = int_to_ptr.vmem [resolvable:$true] %s29_s15 }
   0x5   :  { %s122_s16 = scalar_lea.vmem %s20_s13, 256  ;;  %p127_p1 = scmp.lt.s32.totalorder %s20_s13, %s20_s13 }
   0x6   :  { %p123_p0 = scmp.ne.s32.totalorder %s20_s13, %s122_s16  ;;  %p128_p2 = scmp.lt.s32.totalorder %s122_s16, %s122_s16 }
   0x8   :  { %p129_p3 = por %p128_p2, %p127_p1 }
   0xa   :  { %p130_p4 = pnand %p129_p3, %p123_p0 }
   0xc   :  { %133 = shalt.err (!%p130_p4)
}
   0xd   :  { %22 = dma.hbm_to_vmem [thread:$0]  %s238_s0, 256, %s20_s13, [#allocation5]  }
   0xe   :  { %s142_s19 = scalar_lea.vmem %s30_s15, 256  ;;  %p147_p6 = scmp.lt.s32.totalorder %s30_s15, %s30_s15 }
   0xf   :  { %p143_p5 = scmp.ne.s32.totalorder %s30_s15, %s142_s19  ;;  %p148_p7 = scmp.lt.s32.totalorder %s142_s19, %s142_s19 }
  0x11   :  { %p149_p8 = por %p148_p7, %p147_p6 }
  0x13   :  { %p150_p9 = pnand %p149_p8, %p143_p5 }
  0x15   :  { %153 = shalt.err (!%p150_p9)
}
  0x16   :  { %32 = dma.hbm_to_vmem [thread:$0]  %s239_s1, 256, %s30_s15, [#allocation8]  }
  0x17   :  { %194 = dma.done.wait [#allocation5], 256  }
  0x18   :  { %195 = vsyncadd [#allocation5], 4294967040 }
  0x19   :  { %196 = dma.done.wait [#allocation8], 256  }
  0x1a   :  { %197 = vsyncadd [#allocation8], 4294967040  ;;  %v45_v0 = vld [vmem:[#allocation4] sm:$0xff]  ;;  %v46_v1 = vld [vmem:[#allocation4 + $0x8] sm:$0xff]  ;;  %s204_s0 = smov [#allocation9]   ;;  %s205_s22 = smov [#allocation10]  }
  0x1b   :  { %v49_v2 = vmul.f32 0.5, %v45_v0  ;;  %v50_v3 = vmul.f32 0.5, %v46_v1  ;;  %v47_v7 = vld [vmem:[#allocation7] sm:$0xff]  ;;  %v48_v9 = vld [vmem:[#allocation7 + $0x8] sm:$0xff]  ;;  %s82_s1 = sshll.u32 %s204_s0, 4  ;;  %s92_s23 = sshll.u32 %s205_s22, 4  ;;  %s83_s1 = int_to_ptr.vmem [resolvable:$true] %s82_s1  ;;  %s93_s23 = int_to_ptr.vmem [resolvable:$true] %s92_s23 }
  0x1c   :  { %s154_s24 = scalar_lea.vmem %s83_s1, 128  ;;  %p159_p11 = scmp.lt.s32.totalorder %s83_s1, %s83_s1 }
  0x1d   :  { %110 = vtanh.f32 %v49_v2  ;;  %p155_p10 = scmp.ne.s32.totalorder %s83_s1, %s154_s24  ;;  %p160_p12 = scmp.lt.s32.totalorder %s154_s24, %s154_s24 }
  0x1e   :  { %112 = vtanh.f32 %v50_v3 }
  0x1f   :  { %p161_p13 = por %p160_p12, %p159_p11 }
  0x21   :  { %p162_p0 = pnand %p161_p13, %p155_p10 }
  0x2a   :  { %v111_v4 = vpop.eup %110 }
  0x2b   :  { %v113_v5 = vpop.eup %112  ;;  %v53_v6 = vadd.f32 1.0, %v111_v4 }
  0x2c   :  { %v54_v8 = vadd.f32 1.0, %v113_v5 }
  0x2d   :  { %v55_v10 = vmul.f32 0.5, %v53_v6 }
  0x2e   :  { %v56_v11 = vmul.f32 0.5, %v54_v8 }
  0x2f   :  { %v57_v12 = vmul.f32 %v55_v10, %v47_v7  ;;  %v59_v13 = vadd.f32 %v55_v10, %v47_v7 }
  0x30   :  { %v58_v14 = vmul.f32 %v56_v11, %v48_v9  ;;  %v60_v15 = vadd.f32 %v56_v11, %v48_v9 }
  0x32   :  { %v61_v16 = vadd.f32 %v58_v14, %v57_v12  ;;  %v62_v17 = vadd.f32 %v60_v15, %v59_v13 }
  0x34   :  { %73 = vst [vmem:[#allocation9] sm:$0xff] %v61_v16  ;;  %75 = vst [vmem:[#allocation10] sm:$0xff] %v62_v17 }
  0x35   :  { %165 = shalt.err (!%p162_p0)
}
  0x36   :  { %85 = dma.vmem_to_hbm [thread:$0]  %s83_s1, 128, %s240_s2, [#allocation6]  }
  0x37   :  { %s174_s27 = scalar_lea.vmem %s93_s23, 128  ;;  %p179_p2 = scmp.lt.s32.totalorder %s93_s23, %s93_s23 }
  0x38   :  { %p175_p1 = scmp.ne.s32.totalorder %s93_s23, %s174_s27  ;;  %p180_p3 = scmp.lt.s32.totalorder %s174_s27, %s174_s27 }
  0x3a   :  { %p181_p4 = por %p180_p3, %p179_p2 }
  0x3c   :  { %p182_p5 = pnand %p181_p4, %p175_p1 }
  0x3e   :  { %185 = shalt.err (!%p182_p5)
}
  0x3f   :  { %95 = dma.vmem_to_hbm [thread:$0]  %s93_s23, 128, %s241_s3, [#allocation11]  }
  0x40   :  { %198 = dma.done.wait [#allocation6], 128  }
  0x41   :  { %199 = vsyncadd [#allocation6], 4294967168 }
  0x42   :  { %200 = dma.done.wait [#allocation11], 128  }
  0x43   :  { %201 = vsyncadd [#allocation11], 4294967168 }
  0x44   :  { %102 = vsyncpa [#allocation5], 1 }
  0x45   :  { %103 = vsyncpa [#allocation8], 1 }
  0x46   :  { %104 = vsyncpa [#allocation6], 1 }
  0x47   :  { %105 = vsyncpa [#allocation11], 1 }

</bundles_post_ra>
